<compile_context>
chip_gen: v7x
topology: tpu7x:2x2x1
jax: 0.10.0
libtpu: 0.0.40
codegen_flags: <defaults>
</compile_context>

<pallas_src>
import functools

import jax
import jax.numpy as jnp
from jax.experimental import pallas as pl
from jax.experimental.pallas import tpu as pltpu

EPS = 1e-5  # nn.LayerNorm default


def _round_up(a, m):
    return (a + m - 1) // m * m


def film_kernel(
    d_real,
    x_ref, z_ref, seq_ref, rec_ref,
    ln_g_ref, ln_b_ref,
    w1_ref, b1_ref, w2_ref, b2_ref,
    cln_g_ref, cln_b_ref,
    wgx_ref, wgz_ref, wbx_ref, wbz_ref, bg_ref, bb_ref,
    o_ref,
):
    tm, Dp = x_ref.shape
    inv_d = 1.0 / d_real
    # Lane mask so LayerNorm statistics use the real feature dim, not the
    # lane-padded one.  Constant at compile time.
    lane = jax.lax.broadcasted_iota(jnp.int32, (1, Dp), 1)
    mask = (lane < d_real).astype(jnp.float32)

    def layer_norm(y, g, b):
        m = jnp.sum(y, axis=-1, keepdims=True) * inv_d
        d = (y - m) * mask
        v = jnp.sum(d * d, axis=-1, keepdims=True) * inv_d
        return d * jax.lax.rsqrt(v + EPS) * g + b

    # x = self.layer_norm(x)
    x = x_ref[...].astype(jnp.float32)
    xn = layer_norm(x, ln_g_ref[...], ln_b_ref[...])

    # chemical_proj = Linear(3,64) -> ReLU -> Linear(64,D) -> LayerNorm(D)
    # Shared weights for seq/rec: stack along the sublane axis and run once.
    def lin1(f):  # (tm, 3) -> (tm, 64), 3 broadcast FMAs on the VPU (K=3 MXU is wasteful)
        return (f[:, 0:1] * w1_ref[0:1, :]
                + f[:, 1:2] * w1_ref[1:2, :]
                + f[:, 2:3] * w1_ref[2:3, :]
                + b1_ref[...])

    seq = seq_ref[...].astype(jnp.float32)
    rec = rec_ref[...].astype(jnp.float32)
    h = jnp.concatenate([lin1(seq), lin1(rec)], axis=0)          # (2*tm, 64)
    h = jnp.maximum(h, 0.0)
    y = jnp.dot(h, w2_ref[...], preferred_element_type=jnp.float32) + b2_ref[...]
    y = layer_norm(y, cln_g_ref[...], cln_b_ref[...])            # (2*tm, Dp)

    # z = z.expand(...) + seq_chem + rec_chem  (z is the resident (1, Dp) block)
    zc = z_ref[...].astype(jnp.float32) + y[:tm, :] + y[tm:, :]

    # gamma_beta = film_layer(cat([xn, zc], -1)), split into gamma / beta
    # directly via four (Dp, Dp) weight blocks -> no lane-axis slicing.
    gamma = (jnp.dot(xn, wgx_ref[...], preferred_element_type=jnp.float32)
             + jnp.dot(zc, wgz_ref[...], preferred_element_type=jnp.float32)
             + bg_ref[...])
    beta = (jnp.dot(xn, wbx_ref[...], preferred_element_type=jnp.float32)
            + jnp.dot(zc, wbz_ref[...], preferred_element_type=jnp.float32)
            + bb_ref[...])

    # output = gamma * xn + beta ; dropout in eval mode = identity
    o_ref[...] = (gamma * xn + beta).astype(o_ref.dtype)


def film_forward(x, z, chemical_features, params, *, tm=None):
    """x: (B,S,D)  z: (B,D)  chemical_features: (B,S,6)."""
    B, S, D = x.shape
    Dp = _round_up(D, 128)                  # lane-dense blocks / stores
    if tm is None:
        tm = min(512, _round_up(S, 8))      # biggest row tile the seq allows
    tm = _round_up(tm, 8)
    S_pad = _round_up(S, tm)

    # --- inputs: pad to (B, S_pad, Dp); z stays per-batch (B, 1, Dp) ---
    xp = jnp.pad(x, ((0, 0), (0, S_pad - S), (0, Dp - D)))
    zp = jnp.pad(z, ((0, 0), (0, Dp - D))).reshape(B, 1, Dp)
    seq = jnp.pad(chemical_features[..., 0:3], ((0, 0), (0, S_pad - S), (0, 0)))
    rec = jnp.pad(chemical_features[..., 3:6], ((0, 0), (0, S_pad - S), (0, 0)))

    (ln_g, ln_b, w1, b1, w2, b2, cln_g, cln_b, wf, bf) = params
    pad_vec = lambda v: jnp.pad(v, (0, Dp - D)).reshape(1, Dp)
    pad_mat = lambda m: jnp.pad(m, ((0, Dp - D), (0, Dp - D)))

    # torch Linear stores W as (out, in); use (in, out) for row-major matmul.
    w1_t = w1.T                                           # (3, 64)
    b1_2 = b1.reshape(1, 64)
    w2_t = jnp.pad(w2.T, ((0, 0), (0, Dp - D)))           # (64, Dp)
    b2_2 = pad_vec(b2)
    ln_g2, ln_b2 = pad_vec(ln_g), pad_vec(ln_b)
    cln_g2, cln_b2 = pad_vec(cln_g), pad_vec(cln_b)

    wf_t = wf.T                                           # (2D, 2D) in (in, out)
    w_gx = pad_mat(wf_t[:D, :D])                          # x -> gamma
    w_gz = pad_mat(wf_t[D:, :D])                          # z -> gamma
    w_bx = pad_mat(wf_t[:D, D:])                          # x -> beta
    w_bz = pad_mat(wf_t[D:, D:])                          # z -> beta
    bg = pad_vec(bf[:D])
    bb = pad_vec(bf[D:])

    row_spec = pl.BlockSpec((None, tm, Dp), lambda b, s: (b, s, 0))
    chem_spec = pl.BlockSpec((None, tm, 3), lambda b, s: (b, s, 0))
    z_spec = pl.BlockSpec((None, 1, Dp), lambda b, s: (b, 0, 0))   # resident over s
    full = lambda *shape: pl.BlockSpec(shape, lambda b, s: (0,) * len(shape))

    # Rough VMEM budget: double-buffered blocks + (double-buffered) weights
    # + intermediates.  Clamped so it stays sane across v5e/v6e/v7x.
    block_bytes = 4 * (2 * tm * Dp + 2 * tm * 3 + Dp)
    weight_bytes = 4 * (4 * Dp * Dp + 64 * Dp + 3 * 64 + 64 + 8 * Dp)
    est = 2 * block_bytes + 2 * weight_bytes + 4 * 8 * tm * Dp + (2 << 20)
    vmem_limit = min(max(est, 32 * 1024 * 1024), 96 * 1024 * 1024)
    # TODO(synk): for very large D on v7x (64 MiB VMEM) keep the film weights
    # in bf16 or single-buffer them; the f32 test shapes here are tiny.

    out = pl.pallas_call(
        functools.partial(film_kernel, D),
        out_shape=jax.ShapeDtypeStruct((B, S_pad, Dp), x.dtype),
        grid_spec=pltpu.PrefetchScalarGridSpec(
            num_scalar_prefetch=0,
            grid=(B, S_pad // tm),
            in_specs=[
                row_spec,                     # x
                z_spec,                       # z (per-batch, resident)
                chem_spec,                    # seq chemical features
                chem_spec,                    # rec chemical features
                full(1, Dp), full(1, Dp),     # layer_norm gamma/beta
                full(3, 64), full(1, 64),     # chemical_proj Linear1
                full(64, Dp), full(1, Dp),    # chemical_proj Linear2
                full(1, Dp), full(1, Dp),     # chemical_proj LayerNorm
                full(Dp, Dp), full(Dp, Dp),   # film gamma weights (x / z)
                full(Dp, Dp), full(Dp, Dp),   # film beta weights  (x / z)
                full(1, Dp), full(1, Dp),     # film gamma/beta bias
            ],
            out_specs=row_spec,
        ),
        compiler_params=pltpu.CompilerParams(
            dimension_semantics=("parallel", "parallel"),
            vmem_limit_bytes=vmem_limit,
        ),
    )(
        xp, zp, seq, rec,
        ln_g2, ln_b2,
        w1_t, b1_2, w2_t, b2_2,
        cln_g2, cln_b2,
        w_gx, w_gz, w_bx, w_bz, bg, bb,
    )
    return out[:, :S, :D]


# ----------------------------- reference ------------------------------------

def _layer_norm_ref(y, g, b):
    m = jnp.mean(y, axis=-1, keepdims=True)
    v = jnp.mean((y - m) ** 2, axis=-1, keepdims=True)
    return (y - m) * jax.lax.rsqrt(v + EPS) * g + b


def reference_forward(x, z, chemical_features, params):
    """Pure-JAX reference mirroring the PyTorch module (eval mode)."""
    (ln_g, ln_b, w1, b1, w2, b2, cln_g, cln_b, wf, bf) = params
    B, S, D = x.shape
    xn = _layer_norm_ref(x, ln_g, ln_b)
    zc = jnp.broadcast_to(z[:, None, :], (B, S, D))

    def chem_proj(f):
        h = jnp.maximum(f @ w1.T + b1, 0.0)
        y = h @ w2.T + b2
        return _layer_norm_ref(y, cln_g, cln_b)

    seq_f, rec_f = chemical_features[..., :3], chemical_features[..., 3:]
    zc = zc + chem_proj(seq_f) + chem_proj(rec_f)
    combined = jnp.concatenate([xn, zc], axis=-1)
    gb = combined @ wf.T + bf
    gamma, beta = gb[..., :D], gb[..., D:]
    return gamma * xn + beta  # dropout = identity in eval


def init_params(key, feature_dim):
    D = feature_dim
    ks = jax.random.split(key, 6)
    ln_g = jnp.ones((D,), jnp.float32)
    ln_b = jnp.zeros((D,), jnp.float32)
    w1 = 0.1 * jax.random.normal(ks[0], (64, 3), jnp.float32)     # Linear(3,64)
    b1 = 0.01 * jax.random.normal(ks[1], (64,), jnp.float32)
    w2 = 0.1 * jax.random.normal(ks[2], (D, 64), jnp.float32)     # Linear(64,D)
    b2 = 0.01 * jax.random.normal(ks[3], (D,), jnp.float32)
    cln_g = jnp.ones((D,), jnp.float32)
    cln_b = jnp.zeros((D,), jnp.float32)
    wf = 0.1 * jax.random.normal(ks[4], (2 * D, 2 * D), jnp.float32)  # Linear(2D,2D)
    bf = 0.01 * jax.random.normal(ks[5], (2 * D,), jnp.float32)
    return (ln_g, ln_b, w1, b1, w2, b2, cln_g, cln_b, wf, bf)


if __name__ == "__main__":
    key = jax.random.PRNGKey(0)

    # Case 1: module-sized small shapes (D < 128 exercises the lane-padding path).
    B, S, D = 2, 8, 32
    k_x, k_z, k_c, k_p = jax.random.split(key, 4)
    x = jax.random.normal(k_x, (B, S, D), jnp.float32)
    z = jax.random.normal(k_z, (B, D), jnp.float32)
    chem = jax.random.normal(k_c, (B, S, 6), jnp.float32)
    params = init_params(k_p, D)

    out = jax.block_until_ready(film_forward(x, z, chem, params))
    ref = reference_forward(x, z, chem, params)
    assert out.shape == (B, S, D)
    assert jnp.allclose(out, ref, rtol=1e-4, atol=1e-4), "mismatch vs reference (D=32)"

    # Case 2: lane-aligned D=128, multi-row tiles (no padding path).
    B2, S2, D2 = 2, 64, 128
    k_x2, k_z2, k_c2, k_p2 = jax.random.split(jax.random.PRNGKey(1), 4)
    x2 = jax.random.normal(k_x2, (B2, S2, D2), jnp.float32)
    z2 = jax.random.normal(k_z2, (B2, D2), jnp.float32)
    chem2 = jax.random.normal(k_c2, (B2, S2, 6), jnp.float32)
    params2 = init_params(k_p2, D2)

    out2 = jax.block_until_ready(film_forward(x2, z2, chem2, params2))
    ref2 = reference_forward(x2, z2, chem2, params2)
    assert out2.shape == (B2, S2, D2)
    assert jnp.allclose(out2, ref2, rtol=1e-4, atol=1e-4), "mismatch vs reference (D=128)"

    # TODO(synk): nn.Dropout(0.1) is modeled in eval mode (identity); training-mode
    # stochastic dropout would use pltpu.prng_seed/prng_random_bits.
    print("KERNEL_OK")
</pallas_src>

<mosaic_0001>
module attributes {stable_mosaic.version = 11 : i64} {
  func.func @film_kernel(%arg0: i32, %arg1: i32, %arg2: memref<1x8x128xf32, #tpu.memory_space<vmem>>, %arg3: memref<1x1x128xf32, #tpu.memory_space<vmem>>, %arg4: memref<1x8x3xf32, #tpu.memory_space<vmem>>, %arg5: memref<1x8x3xf32, #tpu.memory_space<vmem>>, %arg6: memref<1x128xf32, #tpu.memory_space<vmem>>, %arg7: memref<1x128xf32, #tpu.memory_space<vmem>>, %arg8: memref<3x64xf32, #tpu.memory_space<vmem>>, %arg9: memref<1x64xf32, #tpu.memory_space<vmem>>, %arg10: memref<64x128xf32, #tpu.memory_space<vmem>>, %arg11: memref<1x128xf32, #tpu.memory_space<vmem>>, %arg12: memref<1x128xf32, #tpu.memory_space<vmem>>, %arg13: memref<1x128xf32, #tpu.memory_space<vmem>>, %arg14: memref<128x128xf32, #tpu.memory_space<vmem>>, %arg15: memref<128x128xf32, #tpu.memory_space<vmem>>, %arg16: memref<128x128xf32, #tpu.memory_space<vmem>>, %arg17: memref<128x128xf32, #tpu.memory_space<vmem>>, %arg18: memref<1x128xf32, #tpu.memory_space<vmem>>, %arg19: memref<1x128xf32, #tpu.memory_space<vmem>>, %arg20: memref<1x8x128xf32, #tpu.memory_space<vmem>>) attributes {dimension_semantics = [#tpu.dimension_semantics<parallel>, #tpu.dimension_semantics<parallel>], iteration_bounds = array<i64: 2, 1>, scalar_prefetch = 0 : i64, scratch_operands = 0 : i64, tpu.core_type = #tpu.core_type<tc>, window_params = [{transform_indices = @transform_0, window_bounds = array<i64: 1, 8, 128>}, {transform_indices = @transform_1, window_bounds = array<i64: 1, 1, 128>}, {transform_indices = @transform_2, window_bounds = array<i64: 1, 8, 3>}, {transform_indices = @transform_3, window_bounds = array<i64: 1, 8, 3>}, {pipeline_mode = #tpu.pipeline_mode<synchronous>, transform_indices = @transform_4, window_bounds = array<i64: 1, 128>}, {pipeline_mode = #tpu.pipeline_mode<synchronous>, transform_indices = @transform_5, window_bounds = array<i64: 1, 128>}, {pipeline_mode = #tpu.pipeline_mode<synchronous>, transform_indices = @transform_6, window_bounds = array<i64: 3, 64>}, {pipeline_mode = #tpu.pipeline_mode<synchronous>, transform_indices = @transform_7, window_bounds = array<i64: 1, 64>}, {pipeline_mode = #tpu.pipeline_mode<synchronous>, transform_indices = @transform_8, window_bounds = array<i64: 64, 128>}, {pipeline_mode = #tpu.pipeline_mode<synchronous>, transform_indices = @transform_9, window_bounds = array<i64: 1, 128>}, {pipeline_mode = #tpu.pipeline_mode<synchronous>, transform_indices = @transform_10, window_bounds = array<i64: 1, 128>}, {pipeline_mode = #tpu.pipeline_mode<synchronous>, transform_indices = @transform_11, window_bounds = array<i64: 1, 128>}, {pipeline_mode = #tpu.pipeline_mode<synchronous>, transform_indices = @transform_12, window_bounds = array<i64: 128, 128>}, {pipeline_mode = #tpu.pipeline_mode<synchronous>, transform_indices = @transform_13, window_bounds = array<i64: 128, 128>}, {pipeline_mode = #tpu.pipeline_mode<synchronous>, transform_indices = @transform_14, window_bounds = array<i64: 128, 128>}, {pipeline_mode = #tpu.pipeline_mode<synchronous>, transform_indices = @transform_15, window_bounds = array<i64: 128, 128>}, {pipeline_mode = #tpu.pipeline_mode<synchronous>, transform_indices = @transform_16, window_bounds = array<i64: 1, 128>}, {pipeline_mode = #tpu.pipeline_mode<synchronous>, transform_indices = @transform_17, window_bounds = array<i64: 1, 128>}, {transform_indices = @transform_18, window_bounds = array<i64: 1, 8, 128>}]} {
    %0 = tpu.iota {dimensions = array<i32: 1>} : vector<1x128xi32>
    %c32_i32 = arith.constant 32 : i32
    %1 = vector.broadcast %c32_i32 : i32 to vector<1x128xi32>
    %2 = arith.cmpi slt, %0, %1 : vector<1x128xi32>
    %3 = arith.extui %2 : vector<1x128xi1> to vector<1x128xi32>
    %4 = arith.sitofp %3 : vector<1x128xi32> to vector<1x128xf32>
    %c0 = arith.constant 0 : index
    %c0_0 = arith.constant 0 : index
    %c0_1 = arith.constant 0 : index
    %5 = vector.load %arg2[%c0, %c0_0, %c0_1] : memref<1x8x128xf32, #tpu.memory_space<vmem>>, vector<1x8x128xf32>
    %6 = vector.shape_cast %5 : vector<1x8x128xf32> to vector<8x128xf32>
    %c0_2 = arith.constant 0 : index
    %c0_3 = arith.constant 0 : index
    %7 = vector.load %arg6[%c0_2, %c0_3] : memref<1x128xf32, #tpu.memory_space<vmem>>, vector<1x128xf32>
    %c0_4 = arith.constant 0 : index
    %c0_5 = arith.constant 0 : index
    %8 = vector.load %arg7[%c0_4, %c0_5] : memref<1x128xf32, #tpu.memory_space<vmem>>, vector<1x128xf32>
    %cst = arith.constant dense<0.000000e+00> : vector<8xf32>
    %9 = vector.multi_reduction <add>, %6, %cst [1] : vector<8x128xf32> to vector<8xf32>
    %10 = vector.shape_cast %9 : vector<8xf32> to vector<8x1xf32>
    %cst_6 = arith.constant 3.125000e-02 : f32
    %11 = vector.broadcast %cst_6 : f32 to vector<8x1xf32>
    %12 = arith.mulf %10, %11 : vector<8x1xf32>
    %13 = vector.broadcast %12 : vector<8x1xf32> to vector<8x128xf32>
    %14 = arith.subf %6, %13 : vector<8x128xf32>
    %15 = vector.broadcast %4 : vector<1x128xf32> to vector<8x128xf32>
    %16 = arith.mulf %14, %15 : vector<8x128xf32>
    %17 = arith.mulf %16, %16 : vector<8x128xf32>
    %cst_7 = arith.constant dense<0.000000e+00> : vector<8xf32>
    %18 = vector.multi_reduction <add>, %17, %cst_7 [1] : vector<8x128xf32> to vector<8xf32>
    %19 = vector.shape_cast %18 : vector<8xf32> to vector<8x1xf32>
    %cst_8 = arith.constant 3.125000e-02 : f32
    %20 = vector.broadcast %cst_8 : f32 to vector<8x1xf32>
    %21 = arith.mulf %19, %20 : vector<8x1xf32>
    %cst_9 = arith.constant 9.99999974E-6 : f32
    %22 = vector.broadcast %cst_9 : f32 to vector<8x1xf32>
    %23 = arith.addf %21, %22 : vector<8x1xf32>
    %24 = math.rsqrt %23 : vector<8x1xf32>
    %25 = vector.broadcast %24 : vector<8x1xf32> to vector<8x128xf32>
    %26 = arith.mulf %16, %25 : vector<8x128xf32>
    %27 = vector.broadcast %7 : vector<1x128xf32> to vector<8x128xf32>
    %28 = arith.mulf %26, %27 : vector<8x128xf32>
    %29 = vector.broadcast %8 : vector<1x128xf32> to vector<8x128xf32>
    %30 = arith.addf %28, %29 : vector<8x128xf32>
    %c0_10 = arith.constant 0 : index
    %c0_11 = arith.constant 0 : index
    %c0_12 = arith.constant 0 : index
    %31 = vector.load %arg4[%c0_10, %c0_11, %c0_12] : memref<1x8x3xf32, #tpu.memory_space<vmem>>, vector<1x8x3xf32>
    %32 = vector.shape_cast %31 : vector<1x8x3xf32> to vector<8x3xf32>
    %c0_13 = arith.constant 0 : index
    %c0_14 = arith.constant 0 : index
    %c0_15 = arith.constant 0 : index
    %33 = vector.load %arg5[%c0_13, %c0_14, %c0_15] : memref<1x8x3xf32, #tpu.memory_space<vmem>>, vector<1x8x3xf32>
    %34 = vector.shape_cast %33 : vector<1x8x3xf32> to vector<8x3xf32>
    %35 = vector.extract_strided_slice %32 {offsets = [0, 0], sizes = [8, 1], strides = [1, 1]} : vector<8x3xf32> to vector<8x1xf32>
    %c0_16 = arith.constant 0 : index
    %c0_17 = arith.constant 0 : index
    %36 = vector.load %arg8[%c0_16, %c0_17] : memref<3x64xf32, #tpu.memory_space<vmem>>, vector<1x64xf32>
    %37 = vector.broadcast %35 : vector<8x1xf32> to vector<8x64xf32>
    %38 = vector.broadcast %36 : vector<1x64xf32> to vector<8x64xf32>
    %39 = arith.mulf %37, %38 : vector<8x64xf32>
    %40 = vector.extract_strided_slice %32 {offsets = [0, 1], sizes = [8, 1], strides = [1, 1]} : vector<8x3xf32> to vector<8x1xf32>
    %c1 = arith.constant 1 : index
    %c0_18 = arith.constant 0 : index
    %41 = vector.load %arg8[%c1, %c0_18] : memref<3x64xf32, #tpu.memory_space<vmem>>, vector<1x64xf32>
    %42 = vector.broadcast %40 : vector<8x1xf32> to vector<8x64xf32>
    %43 = vector.broadcast %41 : vector<1x64xf32> to vector<8x64xf32>
    %44 = arith.mulf %42, %43 : vector<8x64xf32>
    %45 = arith.addf %39, %44 : vector<8x64xf32>
    %46 = vector.extract_strided_slice %32 {offsets = [0, 2], sizes = [8, 1], strides = [1, 1]} : vector<8x3xf32> to vector<8x1xf32>
    %c2 = arith.constant 2 : index
    %c0_19 = arith.constant 0 : index
    %47 = vector.load %arg8[%c2, %c0_19] : memref<3x64xf32, #tpu.memory_space<vmem>>, vector<1x64xf32>
    %48 = vector.broadcast %46 : vector<8x1xf32> to vector<8x64xf32>
    %49 = vector.broadcast %47 : vector<1x64xf32> to vector<8x64xf32>
    %50 = arith.mulf %48, %49 : vector<8x64xf32>
    %51 = arith.addf %45, %50 : vector<8x64xf32>
    %c0_20 = arith.constant 0 : index
    %c0_21 = arith.constant 0 : index
    %52 = vector.load %arg9[%c0_20, %c0_21] : memref<1x64xf32, #tpu.memory_space<vmem>>, vector<1x64xf32>
    %53 = vector.broadcast %52 : vector<1x64xf32> to vector<8x64xf32>
    %54 = arith.addf %51, %53 : vector<8x64xf32>
    %55 = vector.extract_strided_slice %34 {offsets = [0, 0], sizes = [8, 1], strides = [1, 1]} : vector<8x3xf32> to vector<8x1xf32>
    %c0_22 = arith.constant 0 : index
    %c0_23 = arith.constant 0 : index
    %56 = vector.load %arg8[%c0_22, %c0_23] : memref<3x64xf32, #tpu.memory_space<vmem>>, vector<1x64xf32>
    %57 = vector.broadcast %55 : vector<8x1xf32> to vector<8x64xf32>
    %58 = vector.broadcast %56 : vector<1x64xf32> to vector<8x64xf32>
    %59 = arith.mulf %57, %58 : vector<8x64xf32>
    %60 = vector.extract_strided_slice %34 {offsets = [0, 1], sizes = [8, 1], strides = [1, 1]} : vector<8x3xf32> to vector<8x1xf32>
    %c1_24 = arith.constant 1 : index
    %c0_25 = arith.constant 0 : index
    %61 = vector.load %arg8[%c1_24, %c0_25] : memref<3x64xf32, #tpu.memory_space<vmem>>, vector<1x64xf32>
    %62 = vector.broadcast %60 : vector<8x1xf32> to vector<8x64xf32>
    %63 = vector.broadcast %61 : vector<1x64xf32> to vector<8x64xf32>
    %64 = arith.mulf %62, %63 : vector<8x64xf32>
    %65 = arith.addf %59, %64 : vector<8x64xf32>
    %66 = vector.extract_strided_slice %34 {offsets = [0, 2], sizes = [8, 1], strides = [1, 1]} : vector<8x3xf32> to vector<8x1xf32>
    %c2_26 = arith.constant 2 : index
    %c0_27 = arith.constant 0 : index
    %67 = vector.load %arg8[%c2_26, %c0_27] : memref<3x64xf32, #tpu.memory_space<vmem>>, vector<1x64xf32>
    %68 = vector.broadcast %66 : vector<8x1xf32> to vector<8x64xf32>
    %69 = vector.broadcast %67 : vector<1x64xf32> to vector<8x64xf32>
    %70 = arith.mulf %68, %69 : vector<8x64xf32>
    %71 = arith.addf %65, %70 : vector<8x64xf32>
    %c0_28 = arith.constant 0 : index
    %c0_29 = arith.constant 0 : index
    %72 = vector.load %arg9[%c0_28, %c0_29] : memref<1x64xf32, #tpu.memory_space<vmem>>, vector<1x64xf32>
    %73 = vector.broadcast %72 : vector<1x64xf32> to vector<8x64xf32>
    %74 = arith.addf %71, %73 : vector<8x64xf32>
    %75 = tpu.concatenate %54, %74 in 0 : vector<8x64xf32>, vector<8x64xf32> -> vector<16x64xf32>
    %cst_30 = arith.constant 0.000000e+00 : f32
    %76 = vector.broadcast %cst_30 : f32 to vector<16x64xf32>
    %77 = arith.maximumf %75, %76 : vector<16x64xf32>
    %c0_31 = arith.constant 0 : index
    %c0_32 = arith.constant 0 : index
    %78 = vector.load %arg10[%c0_31, %c0_32] : memref<64x128xf32, #tpu.memory_space<vmem>>, vector<64x128xf32>
    %cst_33 = arith.constant dense<0.000000e+00> : vector<16x128xf32>
    %79 = tpu.matmul %77, %78, %cst_33 {dimension_numbers = #tpu.dot_dimension_numbers<[1], [0], [0], [1], [0, 0, 1, 1], [], []>} : vector<16x64xf32>, vector<64x128xf32>, vector<16x128xf32> -> vector<16x128xf32>
    %c0_34 = arith.constant 0 : index
    %c0_35 = arith.constant 0 : index
    %80 = vector.load %arg11[%c0_34, %c0_35] : memref<1x128xf32, #tpu.memory_space<vmem>>, vector<1x128xf32>
    %81 = vector.broadcast %80 : vector<1x128xf32> to vector<16x128xf32>
    %82 = arith.addf %79, %81 : vector<16x128xf32>
    %c0_36 = arith.constant 0 : index
    %c0_37 = arith.constant 0 : index
    %83 = vector.load %arg12[%c0_36, %c0_37] : memref<1x128xf32, #tpu.memory_space<vmem>>, vector<1x128xf32>
    %c0_38 = arith.constant 0 : index
    %c0_39 = arith.constant 0 : index
    %84 = vector.load %arg13[%c0_38, %c0_39] : memref<1x128xf32, #tpu.memory_space<vmem>>, vector<1x128xf32>
    %cst_40 = arith.constant dense<0.000000e+00> : vector<16xf32>
    %85 = vector.multi_reduction <add>, %82, %cst_40 [1] : vector<16x128xf32> to vector<16xf32>
    %86 = vector.shape_cast %85 : vector<16xf32> to vector<16x1xf32>
    %cst_41 = arith.constant 3.125000e-02 : f32
    %87 = vector.broadcast %cst_41 : f32 to vector<16x1xf32>
    %88 = arith.mulf %86, %87 : vector<16x1xf32>
    %89 = vector.broadcast %88 : vector<16x1xf32> to vector<16x128xf32>
    %90 = arith.subf %82, %89 : vector<16x128xf32>
    %91 = vector.broadcast %4 : vector<1x128xf32> to vector<16x128xf32>
    %92 = arith.mulf %90, %91 : vector<16x128xf32>
    %93 = arith.mulf %92, %92 : vector<16x128xf32>
    %cst_42 = arith.constant dense<0.000000e+00> : vector<16xf32>
    %94 = vector.multi_reduction <add>, %93, %cst_42 [1] : vector<16x128xf32> to vector<16xf32>
    %95 = vector.shape_cast %94 : vector<16xf32> to vector<16x1xf32>
    %cst_43 = arith.constant 3.125000e-02 : f32
    %96 = vector.broadcast %cst_43 : f32 to vector<16x1xf32>
    %97 = arith.mulf %95, %96 : vector<16x1xf32>
    %cst_44 = arith.constant 9.99999974E-6 : f32
    %98 = vector.broadcast %cst_44 : f32 to vector<16x1xf32>
    %99 = arith.addf %97, %98 : vector<16x1xf32>
    %100 = math.rsqrt %99 : vector<16x1xf32>
    %101 = vector.broadcast %100 : vector<16x1xf32> to vector<16x128xf32>
    %102 = arith.mulf %92, %101 : vector<16x128xf32>
    %103 = vector.broadcast %83 : vector<1x128xf32> to vector<16x128xf32>
    %104 = arith.mulf %102, %103 : vector<16x128xf32>
    %105 = vector.broadcast %84 : vector<1x128xf32> to vector<16x128xf32>
    %106 = arith.addf %104, %105 : vector<16x128xf32>
    %c0_45 = arith.constant 0 : index
    %c0_46 = arith.constant 0 : index
    %c0_47 = arith.constant 0 : index
    %107 = vector.load %arg3[%c0_45, %c0_46, %c0_47] : memref<1x1x128xf32, #tpu.memory_space<vmem>>, vector<1x1x128xf32>
    %108 = vector.shape_cast %107 : vector<1x1x128xf32> to vector<1x128xf32>
    %109 = vector.extract_strided_slice %106 {offsets = [0, 0], sizes = [8, 128], strides = [1, 1]} : vector<16x128xf32> to vector<8x128xf32>
    %110 = vector.broadcast %108 : vector<1x128xf32> to vector<8x128xf32>
    %111 = arith.addf %110, %109 : vector<8x128xf32>
    %112 = vector.extract_strided_slice %106 {offsets = [8, 0], sizes = [8, 128], strides = [1, 1]} : vector<16x128xf32> to vector<8x128xf32>
    %113 = arith.addf %111, %112 : vector<8x128xf32>
    %c0_48 = arith.constant 0 : index
    %c0_49 = arith.constant 0 : index
    %114 = vector.load %arg14[%c0_48, %c0_49] : memref<128x128xf32, #tpu.memory_space<vmem>>, vector<128x128xf32>
    %cst_50 = arith.constant dense<0.000000e+00> : vector<8x128xf32>
    %115 = tpu.matmul %30, %114, %cst_50 {dimension_numbers = #tpu.dot_dimension_numbers<[1], [0], [0], [1], [0, 0, 1, 1], [], []>} : vector<8x128xf32>, vector<128x128xf32>, vector<8x128xf32> -> vector<8x128xf32>
    %c0_51 = arith.constant 0 : index
    %c0_52 = arith.constant 0 : index
    %116 = vector.load %arg15[%c0_51, %c0_52] : memref<128x128xf32, #tpu.memory_space<vmem>>, vector<128x128xf32>
    %cst_53 = arith.constant dense<0.000000e+00> : vector<8x128xf32>
    %117 = tpu.matmul %113, %116, %cst_53 {dimension_numbers = #tpu.dot_dimension_numbers<[1], [0], [0], [1], [0, 0, 1, 1], [], []>} : vector<8x128xf32>, vector<128x128xf32>, vector<8x128xf32> -> vector<8x128xf32>
    %118 = arith.addf %115, %117 : vector<8x128xf32>
    %c0_54 = arith.constant 0 : index
    %c0_55 = arith.constant 0 : index
    %119 = vector.load %arg18[%c0_54, %c0_55] : memref<1x128xf32, #tpu.memory_space<vmem>>, vector<1x128xf32>
    %120 = vector.broadcast %119 : vector<1x128xf32> to vector<8x128xf32>
    %121 = arith.addf %118, %120 : vector<8x128xf32>
    %c0_56 = arith.constant 0 : index
    %c0_57 = arith.constant 0 : index
    %122 = vector.load %arg16[%c0_56, %c0_57] : memref<128x128xf32, #tpu.memory_space<vmem>>, vector<128x128xf32>
    %cst_58 = arith.constant dense<0.000000e+00> : vector<8x128xf32>
    %123 = tpu.matmul %30, %122, %cst_58 {dimension_numbers = #tpu.dot_dimension_numbers<[1], [0], [0], [1], [0, 0, 1, 1], [], []>} : vector<8x128xf32>, vector<128x128xf32>, vector<8x128xf32> -> vector<8x128xf32>
    %c0_59 = arith.constant 0 : index
    %c0_60 = arith.constant 0 : index
    %124 = vector.load %arg17[%c0_59, %c0_60] : memref<128x128xf32, #tpu.memory_space<vmem>>, vector<128x128xf32>
    %cst_61 = arith.constant dense<0.000000e+00> : vector<8x128xf32>
    %125 = tpu.matmul %113, %124, %cst_61 {dimension_numbers = #tpu.dot_dimension_numbers<[1], [0], [0], [1], [0, 0, 1, 1], [], []>} : vector<8x128xf32>, vector<128x128xf32>, vector<8x128xf32> -> vector<8x128xf32>
    %126 = arith.addf %123, %125 : vector<8x128xf32>
    %c0_62 = arith.constant 0 : index
    %c0_63 = arith.constant 0 : index
    %127 = vector.load %arg19[%c0_62, %c0_63] : memref<1x128xf32, #tpu.memory_space<vmem>>, vector<1x128xf32>
    %128 = vector.broadcast %127 : vector<1x128xf32> to vector<8x128xf32>
    %129 = arith.addf %126, %128 : vector<8x128xf32>
    %130 = arith.mulf %121, %30 : vector<8x128xf32>
    %131 = arith.addf %130, %129 : vector<8x128xf32>
    %c0_64 = arith.constant 0 : index
    %c0_65 = arith.constant 0 : index
    %c0_66 = arith.constant 0 : index
    %132 = vector.load %arg20[%c0_64, %c0_65, %c0_66] : memref<1x8x128xf32, #tpu.memory_space<vmem>>, vector<1x8x128xf32>
    %133 = vector.shape_cast %132 : vector<1x8x128xf32> to vector<8x128xf32>
    %134 = vector.shape_cast %131 : vector<8x128xf32> to vector<1x8x128xf32>
    tpu.vector_store %arg20[%c0_64, %c0_65, %c0_66], %134 {strides = array<i32>} : memref<1x8x128xf32, #tpu.memory_space<vmem>>, vector<1x8x128xf32>,
    return
  }
  func.func @transform_0(%arg0: i32, %arg1: i32) -> (i32, i32, i32) {
    %c0_i32 = arith.constant 0 : i32
    %c0_i32_0 = arith.constant 0 : i32
    return %arg0, %arg1, %c0_i32 : i32, i32, i32
  }
  func.func @transform_1(%arg0: i32, %arg1: i32) -> (i32, i32, i32) {
    %c0_i32 = arith.constant 0 : i32
    %c0_i32_0 = arith.constant 0 : i32
    %c0_i32_1 = arith.constant 0 : i32
    return %arg0, %c0_i32, %c0_i32_0 : i32, i32, i32
  }
  func.func @transform_2(%arg0: i32, %arg1: i32) -> (i32, i32, i32) {
    %c0_i32 = arith.constant 0 : i32
    %c0_i32_0 = arith.constant 0 : i32
    return %arg0, %arg1, %c0_i32 : i32, i32, i32
  }
  func.func @transform_3(%arg0: i32, %arg1: i32) -> (i32, i32, i32) {
    %c0_i32 = arith.constant 0 : i32
    %c0_i32_0 = arith.constant 0 : i32
    return %arg0, %arg1, %c0_i32 : i32, i32, i32
  }
  func.func @transform_4(%arg0: i32, %arg1: i32) -> (i32, i32) {
    %c0_i32 = arith.constant 0 : i32
    %c0_i32_0 = arith.constant 0 : i32
    %c0_i32_1 = arith.constant 0 : i32
    return %c0_i32, %c0_i32_0 : i32, i32
  }
  func.func @transform_5(%arg0: i32, %arg1: i32) -> (i32, i32) {
    %c0_i32 = arith.constant 0 : i32
    %c0_i32_0 = arith.constant 0 : i32
    %c0_i32_1 = arith.constant 0 : i32
    return %c0_i32, %c0_i32_0 : i32, i32
  }
  func.func @transform_6(%arg0: i32, %arg1: i32) -> (i32, i32) {
    %c0_i32 = arith.constant 0 : i32
    %c0_i32_0 = arith.constant 0 : i32
    %c0_i32_1 = arith.constant 0 : i32
    return %c0_i32, %c0_i32_0 : i32, i32
  }
  func.func @transform_7(%arg0: i32, %arg1: i32) -> (i32, i32) {
    %c0_i32 = arith.constant 0 : i32
    %c0_i32_0 = arith.constant 0 : i32
    %c0_i32_1 = arith.constant 0 : i32
    return %c0_i32, %c0_i32_0 : i32, i32
  }
  func.func @transform_8(%arg0: i32, %arg1: i32) -> (i32, i32) {
    %c0_i32 = arith.constant 0 : i32
    %c0_i32_0 = arith.constant 0 : i32
    %c0_i32_1 = arith.constant 0 : i32
    return %c0_i32, %c0_i32_0 : i32, i32
  }
  func.func @transform_9(%arg0: i32, %arg1: i32) -> (i32, i32) {
    %c0_i32 = arith.constant 0 : i32
    %c0_i32_0 = arith.constant 0 : i32
    %c0_i32_1 = arith.constant 0 : i32
    return %c0_i32, %c0_i32_0 : i32, i32
  }
  func.func @transform_10(%arg0: i32, %arg1: i32) -> (i32, i32) {
    %c0_i32 = arith.constant 0 : i32
    %c0_i32_0 = arith.constant 0 : i32
    %c0_i32_1 = arith.constant 0 : i32
    return %c0_i32, %c0_i32_0 : i32, i32
  }
  func.func @transform_11(%arg0: i32, %arg1: i32) -> (i32, i32) {
    %c0_i32 = arith.constant 0 : i32
    %c0_i32_0 = arith.constant 0 : i32
    %c0_i32_1 = arith.constant 0 : i32
    return %c0_i32, %c0_i32_0 : i32, i32
  }
  func.func @transform_12(%arg0: i32, %arg1: i32) -> (i32, i32) {
    %c0_i32 = arith.constant 0 : i32
    %c0_i32_0 = arith.constant 0 : i32
    %c0_i32_1 = arith.constant 0 : i32
    return %c0_i32, %c0_i32_0 : i32, i32
  }
  func.func @transform_13(%arg0: i32, %arg1: i32) -> (i32, i32) {
    %c0_i32 = arith.constant 0 : i32
    %c0_i32_0 = arith.constant 0 : i32
    %c0_i32_1 = arith.constant 0 : i32
    return %c0_i32, %c0_i32_0 : i32, i32
  }
  func.func @transform_14(%arg0: i32, %arg1: i32) -> (i32, i32) {
    %c0_i32 = arith.constant 0 : i32
    %c0_i32_0 = arith.constant 0 : i32
    %c0_i32_1 = arith.constant 0 : i32
    return %c0_i32, %c0_i32_0 : i32, i32
  }
  func.func @transform_15(%arg0: i32, %arg1: i32) -> (i32, i32) {
    %c0_i32 = arith.constant 0 : i32
    %c0_i32_0 = arith.constant 0 : i32
    %c0_i32_1 = arith.constant 0 : i32
    return %c0_i32, %c0_i32_0 : i32, i32
  }
  func.func @transform_16(%arg0: i32, %arg1: i32) -> (i32, i32) {
    %c0_i32 = arith.constant 0 : i32
    %c0_i32_0 = arith.constant 0 : i32
    %c0_i32_1 = arith.constant 0 : i32
    return %c0_i32, %c0_i32_0 : i32, i32
  }
  func.func @transform_17(%arg0: i32, %arg1: i32) -> (i32, i32) {
    %c0_i32 = arith.constant 0 : i32
    %c0_i32_0 = arith.constant 0 : i32
    %c0_i32_1 = arith.constant 0 : i32
    return %c0_i32, %c0_i32_0 : i32, i32
  }
  func.func @transform_18(%arg0: i32, %arg1: i32) -> (i32, i32, i32) {
    %c0_i32 = arith.constant 0 : i32
    %c0_i32_0 = arith.constant 0 : i32
    return %arg0, %arg1, %c0_i32 : i32, i32, i32
  }
}

</mosaic_0001>

<bundles_post_ra>
// kernel: tpu_custom_call.1
= control target key start
LH: loop header
LB: loop body
LE: loop exit
PB: predicated region body
PF: predicated region fallthrough
CT: control target
= control target key end

     0   :  { %s2821_s0 = inlined_call_operand.hbm [shape: f32[2,8,128], index: 0, kind: input, shape index: {}]   ;;  %s2822_s1 = inlined_call_operand.vmem [shape: f32[2,1,128], index: 1, kind: input, shape index: {}]   ;;  %s2823_s2 = inlined_call_operand.vmem [shape: f32[2,8,3], index: 2, kind: input, shape index: {}]   ;;  %s2824_s3 = inlined_call_operand.vmem [shape: f32[2,8,3], index: 3, kind: input, shape index: {}]   ;;  %s2825_s4 = inlined_call_operand.vmem [shape: f32[1,128], index: 4, kind: input, shape index: {}]   ;;  %s2826_s5 = inlined_call_operand.vmem [shape: f32[1,128], index: 5, kind: input, shape index: {}]   ;;  %s2827_s6 = inlined_call_operand.vmem [shape: f32[3,64], index: 6, kind: input, shape index: {}]   ;;  %s2828_s7 = inlined_call_operand.vmem [shape: f32[1,64], index: 7, kind: input, shape index: {}]   ;;  %s2829_s8 = inlined_call_operand.vmem [shape: f32[64,128], index: 8, kind: input, shape index: {}]   ;;  %s2830_s9 = inlined_call_operand.vmem [shape: f32[1,128], index: 9, kind: input, shape index: {}]   ;;  %s2831_s10 = inlined_call_operand.vmem [shape: f32[1,128], index: 10, kind: input, shape index: {}]   ;;  %s2832_s11 = inlined_call_operand.vmem [shape: f32[1,128], index: 11, kind: input, shape index: {}]   ;;  %s2833_s12 = inlined_call_operand.hbm [shape: f32[128,128], index: 12, kind: input, shape index: {}]   ;;  %s2834_s13 = inlined_call_operand.hbm [shape: f32[128,128], index: 13, kind: input, shape index: {}]   ;;  %s2835_s14 = inlined_call_operand.hbm [shape: f32[128,128], index: 14, kind: input, shape index: {}]   ;;  %s2836_s15 = inlined_call_operand.hbm [shape: f32[128,128], index: 15, kind: input, shape index: {}]   ;;  %s2837_s16 = inlined_call_operand.vmem [shape: f32[1,128], index: 16, kind: input, shape index: {}]   ;;  %s2838_s17 = inlined_call_operand.vmem [shape: f32[1,128], index: 17, kind: input, shape index: {}]   ;;  %s2839_s18 = inlined_call_operand.hbm [shape: f32[2,8,128], index: 18, kind: output, shape index: {}]  }
   0x1   :  { %2848 = sst [smem:[#allocation16_spill]] %s2821_s0 }
   0x2   :  { %2849 = sst [smem:[#allocation17_spill]] %s2822_s1 }
   0x3   :  { %2850 = sst [smem:[#allocation18_spill]] %s2823_s2 }
   0x4   :  { %2851 = sst [smem:[#allocation19_spill]] %s2825_s4 }
   0x5   :  { %2852 = sst [smem:[#allocation20_spill]] %s2826_s5 }
   0x6   :  { %2853 = sst [smem:[#allocation21_spill]] %s2828_s7 }
   0x7   :  { %2854 = sst [smem:[#allocation22_spill]] %s2830_s9 }
   0x8   :  { %2855 = sst [smem:[#allocation23_spill]] %s2831_s10 }
   0x9   :  { %2856 = sst [smem:[#allocation24_spill]] %s2832_s11 }
   0xa   :  { %2857 = sst [smem:[#allocation25_spill]] %s2833_s12 }
   0xb   :  { %2858 = sst [smem:[#allocation26_spill]] %s2834_s13 }
   0xc   :  { %2859 = sst [smem:[#allocation27_spill]] %s2837_s16 }
   0xd   :  { %2860 = sst [smem:[#allocation28_spill]] %s2838_s17 }
   0xe   :  { %2861 = sst [smem:[#allocation29_spill]] %s2839_s18 }
   0xf   :  { %23 = vsyncpa [#allocation3], 0 }
  0x10   :  { %25 = vsyncpa [#allocation3 + $0x1], 0 }
  0x11   :  { %26 = vsyncpa [#allocation6], 0 }
  0x12   :  { %27 = vsyncpa [#allocation9], 0 }
  0x13   :  { %28 = vsyncpa [#allocation4], 0 }
  0x14   :  { %30 = vsyncpa [#allocation4 + $0x1], 0  ;;  %s2370_s27 = smov 0   ;;  %s2372_s28 = smov 0  }
  0x15   :  { %s2374_s29 = smov 0   ;;  %s2376_s30 = smov 0  }
  0x16   :  { %s2378_s0 = smov 0   ;;  %s2380_s19 = smov 0  }
  0x17 LB: > { %s2841_s1 = sadd.s32 4294967295, %s2259_s19   ;;  %p1519_p0 = scmp.ge.s32.totalorder %s2259_s19, 1  ;;  %s2259_s19 = sphi %s2380_s19, %s36_s19   ;;  %s2255_s0 = sphi %s2378_s0, %s2897_s0   ;;  %s2251_s30 = sphi %s2376_s30, %s2896_s30   ;;  %s2247_s29 = sphi %s2374_s29, %s2895_s29   ;;  %s2243_s28 = sphi %s2372_s28, %s2894_s28   ;;  %s2239_s27 = sphi %s2370_s27, %s2893_s27  }
  0x18   : > { %p2404_p1 = scmp.eq.s32.totalorder %s2841_s1, 0  ;;  %p485_p2 = scmp.lt.s32.totalorder %s2259_s19, 3 }
  0x19   : > { %s2261_s22 = smov [#allocation5]   ;;  %s2262_s24 = smov [#allocation8]  }
  0x1a   : > { %s2862_s20 = scalar_select %p2404_p1, 1, 0 }
  0x1b   : > { %p2409_p3 = pnand %p1519_p0, %p485_p2  ;;  %s521_s2 = sshll.u32 %s2261_s22, 4  ;;  %s2413_s2 = int_to_ptr.vmem [resolvable:$true] %s521_s2 }
  0x1c   : > { %s547_s25 = sshll.u32 %s2262_s24, 4  ;;  %s2263_s26 = smov [#allocation7]   ;;  %s2424_s25 = int_to_ptr.vmem [resolvable:$true] %s547_s25 }
  0x1d   : > { %s2863_s21 = scalar_select %p2409_p3, 1, 0 }
  0x1e   : > { %p1924_p4 = pneg %p2409_p3  ;;  %s2426_s1 = sshll.u32 %s2263_s26, 4  ;;  %s535_s1 = int_to_ptr.vmem [resolvable:$true] %s2426_s1 }
  0x1f   : > { %s2865_s12 = sld [smem:[#allocation25_spill]] }
  0x20   : > { %p2420_p6 = pnand %p1924_p4, %p2404_p1 }
  0x22   : > { %p2436_p8 = pneg %p2420_p6 }
  0x25   : > { %s2027_s17 = scalar_lea.hbm %s2865_s12, 2048 }
  0x26   : > { %p2028_p7 = scmp.ne.s32.totalorder %s2865_s12, %s2027_s17  ;;  %p2034_p11 = scmp.lt.u32.totalorder %s2027_s17, %s2865_s12 }
  0x28   : > { %p2030_p9 = pnand %p2436_p8, %p2028_p7 }
  0x2a   : > { %p2031_p10 = pneg %p2030_p9 }
  0x2c   : > { %p2036_p12 = pnand %p2034_p11, %p2031_p10 }
  0x2e   : > { %2039 = shalt.err (!%p2036_p12)
}
  0x2f   : > { %s2040_s5 = scalar_lea.vmem %s2413_s2, 2048  ;;  %p2048_p4 = scmp.lt.s32.totalorder %s2413_s2, %s2413_s2 }
  0x30   : > { %p2041_p13 = scmp.ne.s32.totalorder %s2413_s2, %s2040_s5  ;;  %p2049_p5 = scmp.lt.s32.totalorder %s2040_s5, %s2040_s5 }
  0x32   : > { %p2043_p0 = pnand %p2041_p13, %p2436_p8  ;;  %p2050_p7 = por %p2049_p5, %p2048_p4 }
  0x34   : > { %p2044_p2 = pneg %p2043_p0 }
  0x36   : > { %p2051_p9 = pnand %p2050_p7, %p2044_p2 }
  0x38   : > { %2054 = shalt.err (!%p2051_p9)
}
  0x39   : > { %s2264_s16 = smov 128   ;;  %s2265_s17 = smov 8  }
  0x3a   : > { %1927 = dma.hbm_to_vmem [thread:$0]  (!%p2420_p6), %s2865_s12, 2048, %s2413_s2, [#allocation6], %s2264_s16, %s2264_s16, %s2265_s17  }
  0x3b   : > { %s2055_s5 = scalar_lea.hbm %s2835_s14, 2048 }
  0x3c   : > { %p2056_p5 = scmp.ne.s32.totalorder %s2835_s14, %s2055_s5  ;;  %p2062_p12 = scmp.lt.u32.totalorder %s2055_s5, %s2835_s14 }
  0x3e   : > { %p2058_p10 = pnand %p2056_p5, %p2436_p8 }
  0x40   : > { %p2059_p11 = pneg %p2058_p10 }
  0x42   : > { %p2064_p13 = pnand %p2062_p12, %p2059_p11 }
  0x44   : > { %2067 = shalt.err (!%p2064_p13)
}
  0x45   : > { %s2068_s2 = scalar_lea.vmem %s2424_s25, 2048  ;;  %p2076_p7 = scmp.lt.s32.totalorder %s2424_s25, %s2424_s25 }
  0x46   : > { %p2069_p0 = scmp.ne.s32.totalorder %s2424_s25, %s2068_s2  ;;  %p2077_p9 = scmp.lt.s32.totalorder %s2068_s2, %s2068_s2 }
  0x48   : > { %p2071_p2 = pnand %p2069_p0, %p2436_p8  ;;  %p2078_p5 = por %p2077_p9, %p2076_p7 }
  0x4a   : > { %p2072_p4 = pneg %p2071_p2 }
  0x4c   : > { %p2079_p10 = pnand %p2078_p5, %p2072_p4 }
  0x4e   : > { %2082 = shalt.err (!%p2079_p10)
}
  0x4f   : > { %1933 = dma.hbm_to_vmem [thread:$0]  (!%p2420_p6), %s2835_s14, 2048, %s2424_s25, [#allocation9], %s2264_s16, %s2264_s16, %s2265_s17  }
  0x50   : > { %s2867_s13 = sld [smem:[#allocation26_spill]] }
  0x56   : > { %s2083_s18 = scalar_lea.hbm %s2867_s13, 2048 }
  0x57   : > { %p2084_p11 = scmp.ne.s32.totalorder %s2867_s13, %s2083_s18  ;;  %p2090_p0 = scmp.lt.u32.totalorder %s2083_s18, %s2867_s13 }
  0x59   : > { %p2086_p12 = pnand %p2084_p11, %p2436_p8 }
  0x5b   : > { %p2087_p13 = pneg %p2086_p12 }
  0x5d   : > { %p2092_p2 = pnand %p2090_p0, %p2087_p13 }
  0x5f   : > { %2095 = shalt.err (!%p2092_p2)
}
  0x60   : > { %s2096_s2 = scalar_lea.vmem %s535_s1, 2048  ;;  %p2104_p5 = scmp.lt.s32.totalorder %s535_s1, %s535_s1 }
  0x61   : > { %p2097_p4 = scmp.ne.s32.totalorder %s535_s1, %s2096_s2  ;;  %p2105_p10 = scmp.lt.s32.totalorder %s2096_s2, %s2096_s2 }
  0x63   : > { %p2099_p7 = pnand %p2097_p4, %p2436_p8  ;;  %p2106_p3 = por %p2105_p10, %p2104_p5 }
  0x65   : > { %p2100_p9 = pneg %p2099_p7 }
  0x67   : > { %p2107_p1 = pnand %p2106_p3, %p2100_p9 }
  0x69   : > { %2110 = shalt.err (!%p2107_p1)
}
  0x6a   : > { %1930 = dma.hbm_to_vmem [thread:$0]  (!%p2420_p6), %s2867_s13, 2048, %s535_s1, [#allocation6], %s2264_s16, %s2264_s16, %s2265_s17  }
  0x6b   : > { %s2266_s9 = smov [#allocation10]   ;;  %s2111_s22 = scalar_lea.hbm %s2836_s15, 2048 }
  0x6c   : > { %s560_s10 = sshll.u32 %s2266_s9, 4  ;;  %p2112_p1 = scmp.ne.s32.totalorder %s2836_s15, %s2111_s22  ;;  %s561_s10 = int_to_ptr.vmem [resolvable:$true] %s560_s10 }
  0x6d   : > { %p2118_p12 = scmp.lt.u32.totalorder %s2111_s22, %s2836_s15 }
  0x6e   : > { %p2114_p3 = pnand %p2112_p1, %p2436_p8 }
  0x70   : > { %p2115_p11 = pneg %p2114_p3 }
  0x72   : > { %p2120_p13 = pnand %p2118_p12, %p2115_p11 }
  0x74   : > { %2123 = shalt.err (!%p2120_p13)
}
  0x75   : > { %s2124_s1 = scalar_lea.vmem %s561_s10, 2048  ;;  %p2132_p7 = scmp.lt.s32.totalorder %s561_s10, %s561_s10 }
  0x76   : > { %p2125_p0 = scmp.ne.s32.totalorder %s561_s10, %s2124_s1  ;;  %p2133_p9 = scmp.lt.s32.totalorder %s2124_s1, %s2124_s1 }
  0x78   : > { %p2127_p2 = pnand %p2125_p0, %p2436_p8  ;;  %p2134_p5 = por %p2133_p9, %p2132_p7 }
  0x7a   : > { %p2128_p4 = pneg %p2127_p2 }
  0x7c   : > { %p2135_p10 = pnand %p2134_p5, %p2128_p4 }
  0x7e   : > { %2138 = shalt.err (!%p2135_p10)
}
  0x7f   : > { %1936 = dma.hbm_to_vmem [thread:$0]  (!%p2420_p6), %s2836_s15, 2048, %s561_s10, [#allocation9], %s2264_s16, %s2264_s16, %s2265_s17  }
  0x80   : > { %s1518_s4 = sadd.s32 4294967294, %s2259_s19   ;;  %s48_s23 = sadd.s32 1, %s2255_s0 }
  0x81   : > { %p50_p8 = scmp.ge.s32.totalorder %s48_s23, 2  ;;  %s57_s9 = sadd.s32 1, %s2247_s29 }
  0x82   : > { %p64_p1 = scmp.ne.s32.totalorder %s2247_s29, %s2243_s28  ;;  %p65_p3 = scmp.eq.s32.totalorder %s2259_s19, 0 }
  0x83   : > { %s2899_s23 = smov (%p50_p8, %s48_s23), 0  ;;  %p70_p12 = scmp.ne.s32.totalorder %s2243_s28, %s2239_s27 }
  0x84   : > { %p2537_p11 = por %p65_p3, %p64_p1  ;;  %s52_s16 = ssub.s32 %s2255_s0, %s2899_s23 }
  0x85   : > { %s2869_s17 = sadd.s32 4294967295, %s2259_s19   ;;  %p55_p13 = scmp.eq.s32.totalorder %s52_s16, 0 }
  0x86   : > { %p472_p6 = scmp.eq.s32.totalorder %s2869_s17, 1  ;;  %p2870_p0 = scmp.ne.s32.totalorder %s2862_s20, 0 }
  0x87   : > { %p478_p7 = scmp.eq.s32.totalorder %s1518_s4, 1  ;;  %p1949_p5 = scmp.lt.s32.totalorder %s2259_s19, 2 }
  0x88   : > { %p2549_p2 = por %p2870_p0, %p70_p12  ;;  %p2553_p4 = por %p472_p6, %p64_p1 }
  0x89   : > { %s2558_s22 = scalar_select %p55_p13, %s2247_s29, %s57_s9  }
  0x8a   : > { %s2872_s18 = scalar_select %p2553_p4, 1, 0 }
  0x8b   : > { %p2560_p9 = por %p478_p7, %p70_p12  ;;  %s580_s26 = sand.u32 1, %s2247_s29  }
  0x8c   : > { %s1526_s5 = sshll.u32 %s2255_s0, 7  ;;  %s1525_s2 = sshll.u32 %s580_s26, 3 }
  0x8d   : > { %s2873_s24 = scalar_select %p2560_p9, 1, 0 }
  0x8e   : > { %s2874_s7 = sld [smem:[#allocation16_spill]]  ;;  %s584_s4 = scalar_lea.vmem [#allocation2], %s1525_s2 }
  0x8f   : > { %s592_s9 = sshll.u32 %s584_s4, 4  ;;  %p2574_p10 = pnand %p1949_p5, %p2537_p11  ;;  %s2578_s9 = int_to_ptr.vmem [resolvable:$true] %s592_s9 }
  0x90   : > { %s581_s12 = scalar_lea.sflag [#allocation3], %s580_s26 }
  0x91   : > { %p2141_p1 = pneg %p2574_p10 }
  0x94   : > { %s2570_s16 = scalar_lea.hbm %s2874_s7, %s1526_s5  ;;  %s2144_s11 = scalar_lea.hbm %s2874_s7, 256 }
  0x95   : > { %s2139_s13 = scalar_lea.hbm %s2570_s16, 128  ;;  %p2145_p11 = scmp.lt.u32.totalorder %s2570_s16, %s2874_s7 }
  0x96   : > { %p2140_p8 = scmp.ne.s32.totalorder %s2570_s16, %s2139_s13  ;;  %p2146_p6 = scmp.lt.u32.totalorder %s2144_s11, %s2139_s13 }
  0x97   : > { %p2148_p0 = scmp.lt.u32.totalorder %s2139_s13, %s2570_s16 }
  0x98   : > { %p2142_p3 = pnand %p2141_p1, %p2140_p8  ;;  %p2147_p13 = por %p2146_p6, %p2145_p11 }
  0x9a   : > { %p2143_p12 = pneg %p2142_p3  ;;  %p2149_p7 = por %p2148_p0, %p2147_p13 }
  0x9c   : > { %p2150_p5 = pnand %p2149_p7, %p2143_p12 }
  0x9e   : > { %2153 = shalt.err (!%p2150_p5)
}
  0x9f   : > { %s2154_s26 = scalar_lea.vmem %s2578_s9, 128  ;;  %s2267_s4 = smov [#allocation2]  }
  0xa0   : > { %p2155_p8 = scmp.ne.s32.totalorder %s2578_s9, %s2154_s26  ;;  %s2159_s5 = sshll.u32 %s2267_s4, 4  ;;  %s2160_s5 = int_to_ptr.vmem [resolvable:$false] %s2159_s5 }
  0xa1   : > { %s2161_s2 = scalar_lea.vmem %s2160_s5, 256  ;;  %p2162_p4 = scmp.lt.s32.totalorder %s2578_s9, %s2160_s5 }
  0xa2   : > { %p2157_p3 = pnand %p2155_p8, %p2141_p1  ;;  %p2163_p11 = scmp.lt.s32.totalorder %s2161_s2, %s2154_s26 }
  0xa4   : > { %p2158_p9 = pneg %p2157_p3  ;;  %p2164_p6 = por %p2163_p11, %p2162_p4 }
  0xa6   : > { %p2165_p13 = pnand %p2164_p6, %p2158_p9 }
  0xa8   : > { %2168 = shalt.err (!%p2165_p13)
}
  0xa9   : > { %1940 = dma.hbm_to_vmem [thread:$0]  (!%p2574_p10), %s2570_s16, 128, %s2578_s9, %s581_s12  }
  0xaa   : > { %p2876_p12 = scmp.ne.s32.totalorder %s2863_s21, 0 }
  0xab   : > { %s2608_s13 = sand.u32 (!%p2876_p12), 1, %s2243_s28  }
  0xac   : > { %627 = sbr.rel (%p2876_p12) target bundleno = 1135 (0x46f), region = 92  ;;  %s2847_s11 = sshll.u32 (!%p2876_p12), %s2608_s13, 3 }
  0xad   : > { %s630_s1 = scalar_lea.sflag (!%p2876_p12), [#allocation3], %s2608_s13  ;;  %s2614_s25 = scalar_lea.vmem (!%p2876_p12), [#allocation2], %s2847_s11 }
  0xb3   : > { %2222 = dma.done.wait (%p2549_p2), %s630_s1, 128  }
  0xb4   : > { %2224 = vsyncadd (%p2549_p2), %s630_s1, 4294967168  ;;  %p2877_p4 = scmp.ne.s32.totalorder %s2862_s20, 0 }
  0xb6   : > { %2226 = dma.done.wait (%p2877_p4), [#allocation6], 4096  }
  0xb7   : > { %2228 = vsyncadd (%p2877_p4), [#allocation6], 4294963200 }
  0xb8   : > { %2230 = dma.done.wait (%p2877_p4), [#allocation9], 4096  }
  0xb9   : > { %2232 = vsyncadd (%p2877_p4), [#allocation9], 4294963200  ;;  %p719_p9 = scmp.lt.s32.totalorder %s2251_s30, 1  ;;  %v2268_v0 = vmov 0   ;;  %s2878_s4 = sld [smem:[#allocation18_spill]]  ;;  %v834_v3 = vld [vmem:[%s2829_s8] sm:$0xff]  ;;  %v736_v60 = vlaneseq }
  0xba   : > { %2017 = vset.pattern.permute.xlu1 %v2268_v0  ;;  %2015 = vset.pattern.permute.xlu0 %v2268_v0  ;;  %v835_v4 = vld [vmem:[%s2829_s8 + $0x8] sm:$0xff]  ;;  %v2269_v6 = vmov 1   ;;  %v836_v7 = vld [vmem:[%s2829_s8 + $0x10] sm:$0xff]  ;;  %v837_v8 = vld [vmem:[%s2829_s8 + $0x18] sm:$0xff]  ;;  %v2270_v12 = vmov 2   ;;  %vm849_vm0 = vcmask 523264  }
  0xbb   : > { %s2630_s12 = scalar_select %p719_p9, %s2251_s30, 1  ;;  %v1792_v5 = vpack.c.bf16 %v835_v4, %v834_v3  ;;  %v1796_v9 = vpack.c.bf16 %v837_v8, %v836_v7  ;;  %v838_v10 = vld [vmem:[%s2829_s8 + $0x20] sm:$0xff]  ;;  %v839_v11 = vld [vmem:[%s2829_s8 + $0x28] sm:$0xff]  ;;  %v840_v14 = vld [vmem:[%s2829_s8 + $0x30] sm:$0xff]  ;;  %v2271_v50 = vmov 0.0|0.0   ;;  %v737_v61 = vand.u32 127, %v736_v60 }
  0xbc   : > { %v1800_v13 = vpack.c.bf16 %v839_v11, %v838_v10  ;;  %v841_v15 = vld [vmem:[%s2829_s8 + $0x38] sm:$0xff]  ;;  %v1540_v19 = vld [vmem:[%s2827_s6 + $0x1] ss:$0 sm:$0xff]  ;;  %v1539_v22 = vld [vmem:[%s2827_s6] ss:$0 sm:$0xff]  ;;  %s2880_s1 = sld [smem:[#allocation22_spill]]  ;;  %1808 = vmatprep.subr.bf16.mxu1 %v2271_v50 }
  0xbd   : > { %s1534_s21 = sshll.u32 %s2630_s12, 3  ;;  %1793 = vmatprep.subr.bf16.mxu0 %v1792_v5  ;;  %v1804_v16 = vpack.c.bf16 %v841_v15, %v840_v14  ;;  %v1541_v25 = vld [vmem:[%s2827_s6 + $0x2] ss:$0 sm:$0xff]  ;;  %v998_v47 = vld [vmem:[#allocation7] sm:$0xff]  ;;  %v999_v48 = vld [vmem:[#allocation7 + $0x8] sm:$0xff]  ;;  %vm738_vm1 = vcmp.lt.s32.totalorder %v737_v61, 32 }
  0xbe   : > { %s735_s9 = scalar_lea.vmem %s2824_s3, %s1534_s21  ;;  %1795 = vmatpush3.bf16.msra.mxu0 %v1792_v5  ;;  %v741_v46 = vld [vmem:[%s2614_s25] sm:$0xff]  ;;  %v982_v49 = vld [vmem:[#allocation5] sm:$0xff]  ;;  %v1809_v51 = vpack.c.bf16 %v999_v48, %v998_v47  ;;  %v983_v52 = vld [vmem:[#allocation5 + $0x8] sm:$0xff]  ;;  %vm2273_vm2 = vmmov 0   ;;  %s2881_s16 = sld [smem:[#allocation23_spill]] }
  0xbf   : > { %s728_s5 = scalar_lea.vmem %s2878_s4, %s1534_s21  ;;  %v771_v1 = vld [vmem:[%s735_s9] sm:$0xff]  ;;  %1797 = vmatprep.subr.bf16.mxu0 %v1796_v9  ;;  %v1001_v54 = vld [vmem:[#allocation7 + $0x18] sm:$0xff]  ;;  %v1833_v55 = vpack.c.bf16 %v983_v52, %v982_v49  ;;  %v1002_v15 = vld [vmem:[#allocation7 + $0x20] sm:$0xff]  ;;  %s2882_s11 = sld [smem:[#allocation17_spill]] }
  0xc0   : > { %v770_v2 = vld [vmem:[%s728_s5] sm:$0xff]  ;;  %815 = vperm.xlu1 %2017, %v771_v1   ;;  %s2879_s5 = sld [smem:[#allocation21_spill]]  ;;  %v985_v57 = vld [vmem:[#allocation5 + $0x18] sm:$0xff]  ;;  %1810 = vmatpush3.bf16.msra.mxu1 %v1809_v51  ;;  %s2885_s10 = sld [smem:[#allocation20_spill]] }
  0xc1   : > { %775 = vperm.xlu0 %2015, %v770_v2   ;;  %v1000_v53 = vld [vmem:[#allocation7 + $0x10] sm:$0xff]  ;;  %1811 = vmatprep.subr.bf16.mxu1 %v2271_v50  ;;  %v997_v48 = vld [vmem:[#allocation5 + $0x78] sm:$0xff]  ;;  %s2886_s9 = sld [smem:[#allocation27_spill]]  ;;  %s2887_s26 = sld [smem:[#allocation28_spill]] }
  0xc2   : > { %1799 = vmatpush3.bf16.msra.mxu0 %v1796_v9  ;;  %v1543_v41 = vld [vmem:[%s2880_s1] ss:$0 sm:$0xff]  ;;  %v1812_v58 = vpack.c.bf16 %v1001_v54, %v1000_v53  ;;  %s2884_s1 = sld [smem:[#allocation19_spill]]  ;;  %s1552_s4 = sshll.u32 %s2251_s30, 7 }
  0xc3   : > { %1801 = vmatprep.subr.bf16.mxu0 %v1800_v13  ;;  %v984_v56 = vld [vmem:[#allocation5 + $0x10] sm:$0xff]  ;;  %s2889_s25 = sld [smem:[#allocation29_spill]]  ;;  %p2890_p10 = scmp.ne.s32.totalorder %s2872_s18, 0 }
  0xc4   : > { %2018 = vset.pattern.permute.xlu1 %v2269_v6  ;;  %v1836_v59 = vpack.c.bf16 %v985_v57, %v984_v56  ;;  %1813 = vmatpush3.bf16.msra.mxu1 %v1812_v58  ;;  %v996_v47 = vld [vmem:[#allocation5 + $0x70] sm:$0xff]  ;;  %s2274_s21 = smov [#allocation11]  }
  0xc5   : > { %2016 = vset.pattern.permute.xlu0 %v2269_v6  ;;  %820 = vperm.xlu1 %2018, %v771_v1   ;;  %v1854_v51 = vpack.c.bf16 %v997_v48, %v996_v47  ;;  %s721_s17 = scalar_lea.vmem %s2882_s11, %s2630_s12  ;;  %v1189_v47 = vld [vmem:[#allocation10 + $0x58] sm:$0xff]  ;;  %v1172_v48 = vld [vmem:[#allocation8 + $0x50] sm:$0xff] }
  0xc6   : > { %785 = vperm.xlu0 %2016, %v770_v2   ;;  %1803 = vmatpush3.bf16.msra.mxu0 %v1800_v13  ;;  %v1542_v34 = vld [vmem:[%s2879_s5] ss:$0 sm:$0xff]  ;;  %s2883_s5 = sld [smem:[#allocation24_spill]] }
  0xc7   : > { %1805 = vmatprep.subr.bf16.mxu0 %v1804_v16  ;;  %1814 = vmatprep.subr.bf16.mxu1 %v2271_v50 }
  0xc9   : > { %2019 = vset.pattern.permute.xlu1 %v2270_v12 }
  0xca   : > { %2020 = vset.pattern.permute.xlu0 %v2270_v12  ;;  %796 = vperm.xlu1 %2019, %v770_v2   ;;  %v2272_v2 = vmov 0.0  }
  0xcb   : > { %826 = vperm.xlu0 %2020, %v771_v1   ;;  %1807 = vmatpush3.bf16.msra.mxu0 %v1804_v16  ;;  %v1536_v3 = vsel %vm738_vm1, 1.0, %v2272_v2  ;;  %v1003_v16 = vld [vmem:[#allocation7 + $0x28] sm:$0xff] }
  0xcc   : > { %1832 = vmatprep.subr.bf16.mxu0 %v2271_v50  ;;  %1684 = vmatprep.mubr.msk.f32.mxu1 %vm2273_vm2, %v2272_v2 }
 0x13f   : > { %v816_v17 = vpop.permute.xlu1 %815 }
 0x140   : > { %v776_v18 = vpop.permute.xlu0 %775  ;;  %v818_v26 = vmul.f32 %v1539_v22, %v816_v17  ;;  %v986_v17 = vld [vmem:[#allocation5 + $0x20] sm:$0xff] }
 0x141   : > { %v782_v27 = vmul.f32 %v1539_v22, %v776_v18  ;;  %v1815_v18 = vpack.c.bf16 %v1003_v16, %v1002_v15  ;;  %v1005_v22 = vld [vmem:[#allocation7 + $0x38] sm:$0xff]  ;;  %v1162_v15 = vld [vmem:[#allocation8] sm:$0xff]  ;;  %v1163_v16 = vld [vmem:[#allocation8 + $0x8] sm:$0xff] }
 0x143   : > { %1816 = vmatpush3.bf16.msra.mxu1 %v1815_v18 }
 0x144   : > { %v821_v20 = vpop.permute.xlu1 %820  ;;  %1817 = vmatprep.subr.bf16.mxu1 %v2271_v50 }
 0x145   : > { %v786_v21 = vpop.permute.xlu0 %785  ;;  %v823_v23 = vmul.f32 %v1540_v19, %v821_v20 }
 0x146   : > { %v792_v24 = vmul.f32 %v1540_v19, %v786_v21  ;;  %v987_v19 = vld [vmem:[#allocation5 + $0x28] sm:$0xff]  ;;  %v1004_v21 = vld [vmem:[#allocation7 + $0x30] sm:$0xff] }
 0x147   : > { %v824_v30 = vadd.f32 %v823_v23, %v818_v26  ;;  %v1839_v20 = vpack.c.bf16 %v987_v19, %v986_v17  ;;  %v988_v23 = vld [vmem:[#allocation5 + $0x30] sm:$0xff] }
 0x148   : > { %v793_v31 = vadd.f32 %v792_v24, %v782_v27  ;;  %v1818_v24 = vpack.c.bf16 %v1005_v22, %v1004_v21  ;;  %v1006_v27 = vld [vmem:[#allocation7 + $0x40] sm:$0xff]  ;;  %v1881_v21 = vpack.c.bf16 %v1163_v16, %v1162_v15  ;;  %v1180_v22 = vld [vmem:[#allocation10 + $0x10] sm:$0xff] }
 0x149   : > { %v797_v28 = vpop.permute.xlu1 %796 }
 0x14a   : > { %v827_v29 = vpop.permute.xlu0 %826  ;;  %v803_v32 = vmul.f32 %v1541_v25, %v797_v28  ;;  %1819 = vmatpush3.bf16.msra.mxu1 %v1818_v24  ;;  %v1007_v28 = vld [vmem:[#allocation7 + $0x48] sm:$0xff] }
 0x14b   : > { %v829_v33 = vmul.f32 %v1541_v25, %v827_v29  ;;  %v989_v25 = vld [vmem:[#allocation5 + $0x38] sm:$0xff]  ;;  %1820 = vmatprep.subr.bf16.mxu1 %v2271_v50  ;;  %v990_v29 = vld [vmem:[#allocation5 + $0x40] sm:$0xff] }
 0x14c   : > { %v804_v35 = vadd.f32 %v803_v32, %v793_v31  ;;  %v1842_v26 = vpack.c.bf16 %v989_v25, %v988_v23  ;;  %v991_v31 = vld [vmem:[#allocation5 + $0x48] sm:$0xff]  ;;  %v1181_v25 = vld [vmem:[#allocation10 + $0x18] sm:$0xff] }
 0x14d   : > { %v830_v36 = vadd.f32 %v829_v33, %v824_v30  ;;  %v1821_v30 = vpack.c.bf16 %v1007_v28, %v1006_v27  ;;  %v1845_v32 = vpack.c.bf16 %v991_v31, %v990_v29  ;;  %v1008_v33 = vld [vmem:[#allocation7 + $0x50] sm:$0xff]  ;;  %v1860_v27 = vpack.c.bf16 %v1181_v25, %v1180_v22  ;;  %v1182_v29 = vld [vmem:[#allocation10 + $0x20] sm:$0xff] }
 0x14e   : > { %v812_v37 = vadd.f32 %v1542_v34, %v804_v35  ;;  %v992_v35 = vld [vmem:[#allocation5 + $0x50] sm:$0xff]  ;;  %v1166_v31 = vld [vmem:[#allocation8 + $0x20] sm:$0xff] }
 0x14f   : > { %v831_v38 = vadd.f32 %v1542_v34, %v830_v36  ;;  %v1009_v34 = vld [vmem:[#allocation7 + $0x58] sm:$0xff]  ;;  %1822 = vmatpush3.bf16.msra.mxu1 %v1821_v30  ;;  %v1183_v30 = vld [vmem:[#allocation10 + $0x28] sm:$0xff] }
 0x150   : > { %v832_v39 = vmax.f32 %v812_v37, 0.0  ;;  %v1824_v36 = vpack.c.bf16 %v1009_v34, %v1008_v33  ;;  %v993_v37 = vld [vmem:[#allocation5 + $0x58] sm:$0xff]  ;;  %1823 = vmatprep.subr.bf16.mxu1 %v2271_v50  ;;  %v1863_v33 = vpack.c.bf16 %v1183_v30, %v1182_v29 }
 0x151   : > { %v833_v40 = vmax.f32 %v831_v38, 0.0  ;;  %v1848_v38 = vpack.c.bf16 %v993_v37, %v992_v35  ;;  %v1184_v35 = vld [vmem:[#allocation10 + $0x30] sm:$0xff] }
 0x152   : > { %1649 = vmatprep.mubr.msk.f32.mxu0 %vm849_vm0, %v832_v39  ;;  %v1010_v39 = vld [vmem:[#allocation7 + $0x60] sm:$0xff]  ;;  %v1168_v37 = vld [vmem:[#allocation8 + $0x30] sm:$0xff] }
 0x153   : > { %1650 = vmatmul.mubr.msk.f32.vlgmr.msra.gmra.mrb[0].mxu0 %vm849_vm0, %v833_v40  ;;  %v1011_v40 = vld [vmem:[#allocation7 + $0x68] sm:$0xff]  ;;  %1825 = vmatpush3.bf16.msra.mxu1 %v1824_v36  ;;  %v1185_v36 = vld [vmem:[#allocation10 + $0x38] sm:$0xff] }
 0x154   : > { %1834 = vmatpush3.bf16.msra.mxu0 %v1833_v55  ;;  %1719 = vmatprep.mubr.msk.f32.mxu0 %vm2273_vm2, %v2272_v2 }
 0x155   : > { %1835 = vmatprep.subr.bf16.mxu0 %v2271_v50  ;;  %1826 = vmatprep.subr.bf16.mxu1 %v2271_v50 }
 0x158   : > { %1837 = vmatpush3.bf16.msra.mxu0 %v1836_v59 }
 0x159   : > { %1838 = vmatprep.subr.bf16.mxu0 %v2271_v50 }
 0x15c   : > { %1840 = vmatpush3.bf16.msra.mxu0 %v1839_v20 }
 0x15d   : > { %1841 = vmatprep.subr.bf16.mxu0 %v2271_v50 }
 0x160   : > { %1843 = vmatpush3.bf16.msra.mxu0 %v1842_v26  ;;  %v1164_v26 = vld [vmem:[#allocation8 + $0x10] sm:$0xff] }
 0x161   : > { %1844 = vmatprep.subr.bf16.mxu0 %v2271_v50 }
 0x164   : > { %1846 = vmatpush3.bf16.msra.mxu0 %v1845_v32  ;;  %v1167_v32 = vld [vmem:[#allocation8 + $0x28] sm:$0xff] }
 0x165   : > { %1847 = vmatprep.subr.bf16.mxu0 %v2271_v50  ;;  %v1887_v34 = vpack.c.bf16 %v1167_v32, %v1166_v31 }
 0x168   : > { %1849 = vmatpush3.bf16.msra.mxu0 %v1848_v38  ;;  %v1169_v38 = vld [vmem:[#allocation8 + $0x38] sm:$0xff] }
 0x169   : > { %1850 = vmatprep.subr.bf16.mxu0 %v2271_v50 }
 0x226   : > { %v1651_v42 = vpop.f32.mrb[0].mxu0 }
 0x227   : > { %v928_v43 = vadd.f32 %v1651_v42, %v1543_v41  ;;  %v922_v44 = vpop.f32.mrb[1].mxu0  ;;  %v995_v42 = vld [vmem:[#allocation5 + $0x68] sm:$0xff] }
 0x228   : > { %v923_v45 = vadd.f32 %v1543_v41, %v922_v44  ;;  %v994_v41 = vld [vmem:[#allocation5 + $0x60] sm:$0xff] }
 0x229   : > { %935 = vadd.xlane.f32.xlu0 %v928_v43  ;;  %v1851_v44 = vpack.c.bf16 %v995_v42, %v994_v41  ;;  %v1186_v41 = vld [vmem:[#allocation10 + $0x40] sm:$0xff] }
 0x22a   : > { %933 = vadd.xlane.f32.xlu1 %v923_v45  ;;  %v1170_v42 = vld [vmem:[#allocation8 + $0x40] sm:$0xff] }
 0x22b   : > { %1852 = vmatpush3.bf16.msra.mxu0 %v1851_v44 }
 0x22c   : > { %1853 = vmatprep.subr.bf16.mxu0 %v2271_v50 }
 0x22e   : > { %744 = vadd.xlane.f32.xlu1 %v741_v46 }
 0x22f   : > { %1855 = vmatpush3.bf16.msra.mxu0 %v1854_v51 }
 0x230   : > { %1880 = vmatprep.subr.bf16.mxu0 %v2271_v50 }
 0x2b6   : > { %v936_v62 = vpop.xlane.xlu0 %935 }
 0x2b7   : > { %v938_v63 = vmul.f32 0.03125, %v936_v62  ;;  %v934_v0 = vpop.xlane.xlu1 %933 }
 0x2b8   : > { %v937_v1 = vmul.f32 0.03125, %v934_v0 }
 0x2b9   : > { %v940_v4 = vsub.f32 %v928_v43, %v938_v63  ;;  %v1827_v43 = vpack.c.bf16 %v1011_v40, %v1010_v39  ;;  %v1546_v63 = vld [vmem:[%s2881_s16] ss:$0 sm:$0xff]  ;;  %v1866_v39 = vpack.c.bf16 %v1185_v36, %v1184_v35  ;;  %v1890_v40 = vpack.c.bf16 %v1169_v38, %v1168_v37  ;;  %s1346_s16 = scalar_lea.sflag [#allocation4], %s2608_s13 }
 0x2ba   : > { %v939_v5 = vsub.f32 %v923_v45, %v937_v1  ;;  %v1012_v45 = vld [vmem:[#allocation7 + $0x70] sm:$0xff] }
 0x2bb   : > { %v745_v6 = vpop.xlane.xlu1 %744  ;;  %v2686_v7 = vmul.f32 %v1536_v3, %v940_v4  ;;  %1828 = vmatpush3.bf16.msra.mxu1 %v1827_v43  ;;  %v1171_v43 = vld [vmem:[#allocation8 + $0x48] sm:$0xff] }
 0x2bc   : > { %v746_v8 = vmul.f32 0.03125, %v745_v6  ;;  %v2688_v9 = vmul.f32 %v1536_v3, %v939_v5  ;;  %1829 = vmatprep.subr.bf16.mxu1 %v2271_v50 }
 0x2bd   : > { %v944_v10 = vmul.f32 %v2686_v7, %v2686_v7 }
 0x2be   : > { %v747_v11 = vsub.f32 %v741_v46, %v746_v8  ;;  %v943_v12 = vmul.f32 %v2688_v9, %v2688_v9  ;;  %v1013_v46 = vld [vmem:[#allocation7 + $0x78] sm:$0xff]  ;;  %v1548_v8 = vld [vmem:[%s721_s17] ss:$0 sm:$0xff] }
 0x2bf   : > { %947 = vadd.xlane.f32.xlu1 %v944_v10  ;;  %v1830_v49 = vpack.c.bf16 %v1013_v46, %v1012_v45  ;;  %v1537_v10 = vld [vmem:[%s2884_s1] ss:$0 sm:$0xff]  ;;  %v1893_v45 = vpack.c.bf16 %v1171_v43, %v1170_v42 }
 0x2c0   : > { %945 = vadd.xlane.f32.xlu0 %v943_v12  ;;  %v2694_v13 = vmul.f32 %v1536_v3, %v747_v11  ;;  %v1547_v3 = vld [vmem:[%s2883_s5] ss:$0 sm:$0xff]  ;;  %v1178_v11 = vld [vmem:[#allocation10] sm:$0xff]  ;;  %s2888_s5 = sshll.u32 %s2608_s13, 3 }
 0x2c1   : > { %1831 = vmatpush3.bf16.msra.mxu1 %v1830_v49  ;;  %v1188_v46 = vld [vmem:[#allocation10 + $0x50] sm:$0xff]  ;;  %v1173_v49 = vld [vmem:[#allocation8 + $0x58] sm:$0xff]  ;;  %s718_s20 = scalar_lea.vmem [#allocation11], %s2888_s5 }
 0x2c2   : > { %v749_v14 = vmul.f32 %v2694_v13, %v2694_v13  ;;  %1856 = vmatprep.subr.bf16.mxu1 %v2271_v50  ;;  %v1872_v51 = vpack.c.bf16 %v1189_v47, %v1188_v46  ;;  %s1360_s2 = sshll.u32 %s718_s20, 4  ;;  %s2774_s2 = int_to_ptr.vmem [resolvable:$true] %s1360_s2 }
 0x2c3   : > { %s2169_s30 = scalar_lea.vmem %s2774_s2, 128 }
 0x2c4   : > { %750 = vadd.xlane.f32.xlu0 %v749_v14  ;;  %v1179_v14 = vld [vmem:[#allocation10 + $0x8] sm:$0xff]  ;;  %p2170_p2 = scmp.ne.s32.totalorder %s2774_s2, %s2169_s30 }
 0x2c5   : > { %v1857_v20 = vpack.c.bf16 %v1179_v14, %v1178_v11 }
 0x2c6   : > { %p2171_p1 = pnand %p2170_p2, %p2890_p10 }
 0x2c8   : > { %p2172_p0 = pneg %p2171_p1 }
 0x34c   : > { %v948_v52 = vpop.xlane.xlu1 %947 }
 0x34d   : > { %v950_v53 = vmul.f32 0.03125, %v948_v52  ;;  %v946_v54 = vpop.xlane.xlu0 %945  ;;  %v1896_v52 = vpack.c.bf16 %v1173_v49, %v1172_v48 }
 0x34e   : > { %v949_v55 = vmul.f32 0.03125, %v946_v54  ;;  %v1191_v54 = vld [vmem:[#allocation10 + $0x68] sm:$0xff] }
 0x34f   : > { %v952_v56 = vadd.f32 1e-05, %v950_v53  ;;  %v1190_v53 = vld [vmem:[#allocation10 + $0x60] sm:$0xff] }
 0x350   : > { %v951_v57 = vadd.f32 1e-05, %v949_v55  ;;  %v1174_v55 = vld [vmem:[#allocation8 + $0x60] sm:$0xff] }
 0x351   : > { %2021 = vrsqrt.f32 %v952_v56  ;;  %v751_v58 = vpop.xlane.xlu0 %750  ;;  %v1175_v56 = vld [vmem:[#allocation8 + $0x68] sm:$0xff] }
 0x352   : > { %2023 = vrsqrt.f32 %v951_v57  ;;  %v752_v59 = vmul.f32 0.03125, %v751_v58  ;;  %v1875_v57 = vpack.c.bf16 %v1191_v54, %v1190_v53  ;;  %v1899_v58 = vpack.c.bf16 %v1175_v56, %v1174_v55 }
 0x354   : > { %v753_v60 = vadd.f32 1e-05, %v752_v59  ;;  %v1192_v59 = vld [vmem:[#allocation10 + $0x70] sm:$0xff] }
 0x356   : > { %2025 = vrsqrt.f32 %v753_v60  ;;  %v1193_v60 = vld [vmem:[#allocation10 + $0x78] sm:$0xff] }
 0x35b   : > { %v2022_v61 = vpop.eup %2021 }
 0x35c   : > { %v2024_v62 = vpop.eup %2023  ;;  %v956_v0 = vmul.f32 %v2022_v61, %v2686_v7  ;;  %v1176_v61 = vld [vmem:[#allocation8 + $0x70] sm:$0xff] }
 0x35d   : > { %v955_v1 = vmul.f32 %v2024_v62, %v2688_v9  ;;  %v1538_v9 = vld [vmem:[%s2885_s10] ss:$0 sm:$0xff]  ;;  %v1177_v62 = vld [vmem:[#allocation8 + $0x78] sm:$0xff]  ;;  %s2772_s10 = scalar_lea.hbm %s2889_s25, %s1552_s4 }
 0x35e   : > { %v964_v5 = vmul.f32 %v1546_v63, %v956_v0  ;;  %v1902_v0 = vpack.c.bf16 %v1177_v62, %v1176_v61 }
 0x35f   : > { %v963_v4 = vmul.f32 %v1546_v63, %v955_v1  ;;  %v1878_v63 = vpack.c.bf16 %v1193_v60, %v1192_v59 }
 0x360   : > { %v2026_v6 = vpop.eup %2025  ;;  %v972_v17 = vadd.f32 %v1547_v3, %v964_v5 }
 0x361   : > { %v971_v7 = vadd.f32 %v1547_v3, %v963_v4  ;;  %v755_v12 = vmul.f32 %v2026_v6, %v2694_v13  ;;  %v1165_v13 = vld [vmem:[#allocation8 + $0x18] sm:$0xff] }
 0x362   : > { %v1884_v28 = vpack.c.bf16 %v1165_v13, %v1164_v26 }
 0x363   : > { %v980_v18 = vadd.f32 %v1548_v8, %v971_v7  ;;  %v762_v19 = vmul.f32 %v1537_v10, %v755_v12  ;;  %v1549_v8 = vld [vmem:[%s2886_s9] ss:$0 sm:$0xff]  ;;  %s2173_s9 = sshll.u32 %s2274_s21, 4  ;;  %s2174_s9 = int_to_ptr.vmem [resolvable:$false] %s2173_s9 }
 0x364   : > { %v1550_v7 = vld [vmem:[%s2887_s26] ss:$0 sm:$0xff]  ;;  %s2175_s11 = scalar_lea.vmem %s2174_s9, 256  ;;  %p2176_p7 = scmp.lt.s32.totalorder %s2774_s2, %s2174_s9 }
 0x365   : > { %v2733_v23 = vadd.f32 %v980_v18, %v972_v17  ;;  %v2735_v24 = vadd.f32 %v1538_v9, %v762_v19  ;;  %p2177_p5 = scmp.lt.s32.totalorder %s2175_s11, %s2169_s30 }
 0x367   : > { %1685 = vmatmul.mubr.f32.vlgmr.msra.gmra.mrb[0].mxu1 %v2733_v23  ;;  %1720 = vmatmul.mubr.f32.vlgmr.msra.gmra.mrb[2].mxu0 %v2735_v24  ;;  %p2178_p8 = por %p2177_p5, %p2176_p7 }
 0x368   : > { %1858 = vmatpush3.bf16.msra.mxu1 %v1857_v20  ;;  %1882 = vmatpush3.bf16.msra.mxu0 %v1881_v21 }
 0x369   : > { %1859 = vmatprep.subr.bf16.mxu1 %v2271_v50  ;;  %1883 = vmatprep.subr.bf16.mxu0 %v2271_v50  ;;  %p2179_p3 = pnand %p2178_p8, %p2172_p0 }
 0x36a   : > { %1754 = vmatprep.mubr.msk.f32.mxu1 %vm2273_vm2, %v2272_v2  ;;  %1789 = vmatprep.mubr.msk.f32.mxu0 %vm2273_vm2, %v2272_v2  ;;  %v1187_v2 = vld [vmem:[#allocation10 + $0x48] sm:$0xff] }
 0x36b   : > { %v1869_v44 = vpack.c.bf16 %v1187_v2, %v1186_v41 }
 0x36c   : > { %1861 = vmatpush3.bf16.msra.mxu1 %v1860_v27  ;;  %1885 = vmatpush3.bf16.msra.mxu0 %v1884_v28 }
 0x36d   : > { %1862 = vmatprep.subr.bf16.mxu1 %v2271_v50  ;;  %1886 = vmatprep.subr.bf16.mxu0 %v2271_v50 }
 0x370   : > { %1864 = vmatpush3.bf16.msra.mxu1 %v1863_v33  ;;  %1888 = vmatpush3.bf16.msra.mxu0 %v1887_v34 }
 0x371   : > { %1865 = vmatprep.subr.bf16.mxu1 %v2271_v50  ;;  %1889 = vmatprep.subr.bf16.mxu0 %v2271_v50 }
 0x374   : > { %1867 = vmatpush3.bf16.msra.mxu1 %v1866_v39  ;;  %1891 = vmatpush3.bf16.msra.mxu0 %v1890_v40 }
 0x375   : > { %1868 = vmatprep.subr.bf16.mxu1 %v2271_v50  ;;  %1892 = vmatprep.subr.bf16.mxu0 %v2271_v50 }
 0x378   : > { %1870 = vmatpush3.bf16.msra.mxu1 %v1869_v44  ;;  %1894 = vmatpush3.bf16.msra.mxu0 %v1893_v45 }
 0x379   : > { %1871 = vmatprep.subr.bf16.mxu1 %v2271_v50  ;;  %1895 = vmatprep.subr.bf16.mxu0 %v2271_v50 }
 0x37c   : > { %1873 = vmatpush3.bf16.msra.mxu1 %v1872_v51  ;;  %1897 = vmatpush3.bf16.msra.mxu0 %v1896_v52 }
 0x37d   : > { %1874 = vmatprep.subr.bf16.mxu1 %v2271_v50  ;;  %1898 = vmatprep.subr.bf16.mxu0 %v2271_v50 }
 0x380   : > { %1876 = vmatpush3.bf16.msra.mxu1 %v1875_v57  ;;  %1900 = vmatpush3.bf16.msra.mxu0 %v1899_v58 }
 0x381   : > { %1877 = vmatprep.subr.bf16.mxu1 %v2271_v50  ;;  %1901 = vmatprep.subr.bf16.mxu0 %v2271_v50 }
 0x384   : > { %1879 = vmatpush3.bf16.msra.mxu1 %v1878_v63  ;;  %1903 = vmatpush3.bf16.msra.mxu0 %v1902_v0 }
 0x387   : > { %1755 = vmatmul.mubr.f32.vlgmr.msra.gmra.mrb[2].mxu1 %v2733_v23  ;;  %1790 = vmatmul.mubr.f32.vlgmr.msra.gmra.mrb[4].mxu0 %v2735_v24 }
 0x43a   : > { %v1080_v1 = vpop.f32.mrb[0].mxu1  ;;  %v1150_v3 = vpop.f32.mrb[2].mxu0 }
 0x43b   : > { %v1151_v4 = vadd.f32 %v1150_v3, %v1080_v1  ;;  %v1686_v5 = vpop.f32.mrb[1].mxu1  ;;  %v1721_v6 = vpop.f32.mrb[3].mxu0 }
 0x43d   : > { %v1161_v10 = vadd.f32 %v1549_v8, %v1151_v4 }
 0x43f   : > { %v1342_v16 = vmul.f32 %v1161_v10, %v2735_v24 }
 0x45a   : > { %v1260_v50 = vpop.f32.mrb[2].mxu1  ;;  %v1330_v11 = vpop.f32.mrb[4].mxu0 }
 0x45b   : > { %v1331_v12 = vadd.f32 %v1330_v11, %v1260_v50  ;;  %v1756_v14 = vpop.f32.mrb[3].mxu1  ;;  %v1791_v15 = vpop.f32.mrb[5].mxu0 }
 0x45d   : > { %v1341_v9 = vadd.f32 %v1550_v7, %v1331_v12 }
 0x45f   : > { %v1343_v17 = vadd.f32 %v1342_v16, %v1341_v9 }
 0x461   : > { %1344 = vst [vmem:[%s718_s20] sm:$0xff] %v1343_v17 }
 0x462   : > { %2182 = shalt.err (!%p2179_p3)
}
 0x463   : > { %s2183_s13 = scalar_lea.hbm %s2772_s10, 128  ;;  %s2187_s4 = scalar_lea.hbm %s2889_s25, 256 }
 0x464   : > { %p2184_p11 = scmp.ne.s32.totalorder %s2772_s10, %s2183_s13  ;;  %p2188_p12 = scmp.lt.u32.totalorder %s2772_s10, %s2889_s25 }
 0x465   : > { %p2189_p4 = scmp.lt.u32.totalorder %s2187_s4, %s2183_s13  ;;  %p2191_p2 = scmp.lt.u32.totalorder %s2183_s13, %s2772_s10 }
 0x466   : > { %p2185_p6 = pnand %p2184_p11, %p2890_p10 }
 0x467   : > { %p2190_p9 = por %p2189_p4, %p2188_p12 }
 0x468   : > { %p2186_p13 = pneg %p2185_p6 }
 0x469   : > { %p2192_p1 = por %p2191_p2, %p2190_p9 }
 0x46b   : > { %p2193_p0 = pnand %p2192_p1, %p2186_p13 }
 0x46d   : > { %2196 = shalt.err (!%p2193_p0)
}
 0x46e   : > { %1922 = dma.vmem_to_hbm [thread:$0]  (%p2890_p10), %s2774_s2, 128, %s2772_s10, %s1346_s16  }
 0x46f PF: > { %s1372_s1 = sand.u32 1, %s2239_s27   ;;  %p2891_p7 = scmp.ne.s32.totalorder %s2873_s24, 0 }
 0x470   : > { %p2892_p5 = scmp.ge.s32.totalorder %s2259_s19, 2  ;;  %s1373_s12 = scalar_lea.sflag [#allocation4], %s1372_s1 }
 0x472   : > { %p1942_p8 = pnand %p2892_p5, %p2891_p7 }
 0x474   : > { %2234 = dma.done.wait (!%p1942_p8), %s1373_s12, 128  }
 0x475   : > { %2236 = vsyncadd (!%p1942_p8), %s1373_s12, 4294967168  ;;  %s36_s19 = sadd.s32 1, %s2259_s19   ;;  %s2893_s27 = smov %s2243_s28 }
 0x476   : > { %p33_p3 = scmp.ge.s32.totalorder %s36_s19, 4   ;;  %s2894_s28 = smov %s2247_s29 }
 0x477   : > { %s2895_s29 = smov %s2558_s22  ;;  %s2896_s30 = smov %s2255_s0 }
 0x478   : > { %s2897_s0 = smov %s2899_s23  ;;  %35 = sbr.rel (!%p33_p3) target bundleno = 23 (0x17), region = 162 }
 0x47f   :  { %1378 = vsyncpa [#allocation3], 1 }
 0x480   :  { %1380 = vsyncpa [#allocation3 + $0x1], 1 }
 0x481   :  { %1381 = vsyncpa [#allocation6], 1 }
 0x482   :  { %1382 = vsyncpa [#allocation9], 1 }
 0x483   :  { %1383 = vsyncpa [#allocation4], 1 }
 0x484   :  { %1385 = vsyncpa [#allocation4 + $0x1], 1 }

</bundles_post_ra>
